<compile_context>
chip_gen: v6e
topology: v6e:2x2x1
jax: 0.10.0
libtpu: 0.0.40
codegen_flags: <defaults>
</compile_context>

<pallas_src>
import functools

import jax
import jax.numpy as jnp
from jax import lax
from jax.experimental import pallas as pl
from jax.experimental.pallas import tpu as pltpu

_LANES = 128
_MAX_TILE_ROWS = 8192   # 2 inputs x 2 buffers x 4 MiB = 16 MiB double-buffered


def _round_up(x, m):
    return ((x + m - 1) // m) * m


def _cdiv(a, b):
    return -(-a // b)


def _qfocal_kernel(pred_ref, true_ref, out_ref, *,
                   gamma, alpha, pos_weight, n_valid, tile_rows,
                   n_inner, num_blocks, needs_mask, has_dup, approx_sigmoid):
    o = pl.program_id(0)      # outer axis (split across TCs on v7x)
    i = pl.program_id(1)      # reduction axis (last, "arbitrary")
    blk = o * n_inner + i     # unclamped global block id

    @pl.when(i == 0)
    def _init():
        out_ref[...] = jnp.zeros_like(out_ref)

    def compute_and_accumulate():
        x = pred_ref[...].astype(jnp.float32)
        t = true_ref[...].astype(jnp.float32)

        # Numerically stable BCE-with-logits (pos_weight), reduction='none':
        #   bce = (1-t)*x + (1 + (pw-1)*t) * (log1p(exp(-|x|)) + max(-x, 0))
        e = jnp.exp(-jnp.abs(x))                       # shared with sigmoid
        softplus_negabs = jnp.log1p(e) + jnp.maximum(-x, 0.0)
        if pos_weight == 1.0:
            bce = (1.0 - t) * x + softplus_negabs
        else:
            bce = (1.0 - t) * x + (1.0 + (pos_weight - 1.0) * t) * softplus_negabs

        # sigmoid(x) reusing e = exp(-|x|):  x>=0 -> 1/(1+e),  x<0 -> e/(1+e)
        # (approx reciprocal runs on the otherwise-idle EUP slot; set
        #  approx_sigmoid=False for exact parity checks against PyTorch)
        r = pl.reciprocal(1.0 + e, approx=approx_sigmoid)
        p = jnp.where(x >= 0.0, r, e * r)

        # alpha_factor = t*alpha + (1-t)*(1-alpha), constants folded (2 VPU ops)
        alpha_factor = (1.0 - alpha) + t * (2.0 * alpha - 1.0)
        d = jnp.abs(t - p)
        if gamma == 1.5:
            mod = d * jnp.sqrt(d)                      # |t-p|**1.5 without pow
        elif gamma == 2.0:
            mod = d * d
        elif gamma == 1.0:
            mod = d
        else:
            # General gamma: guard d == 0 so log/exp-based pow can't emit NaN.
            mod = jnp.where(d > 0.0, jnp.power(jnp.maximum(d, 1e-30), gamma), 0.0)

        loss = bce * alpha_factor * mod

        def accumulate(vals):
            # Reduce only over the leading vreg-tile axis (pure VPU adds, no
            # XLU); the cross-lane/sublane reduce + divide happen once in XLA.
            psum = vals.reshape(tile_rows // 8, 8, _LANES).sum(axis=0)
            out_ref[...] += psum[None]

        if not needs_mask:
            accumulate(loss)
        else:
            # Only the last real block can cross n_valid (lane padding and/or
            # stale VMEM rows of a partial trailing block); every earlier
            # block is fully valid and the duplicated clamped block is
            # skipped entirely below, so the tail-mask work is paid exactly
            # once per outer program at most.
            @pl.when(blk < num_blocks - 1)
            def _full():
                accumulate(loss)

            @pl.when(blk == num_blocks - 1)
            def _tail():
                base = (num_blocks - 1) * tile_rows * _LANES
                row_iota = lax.broadcasted_iota(jnp.int32, (tile_rows, _LANES), 0)
                lane_iota = lax.broadcasted_iota(jnp.int32, (tile_rows, _LANES), 1)
                gidx = base + row_iota * _LANES + lane_iota
                accumulate(jnp.where(gidx < n_valid, loss, 0.0))

    if has_dup:
        # Duplicated clamped trailing grid block: DMA still happens but all
        # EUP/VPU work (the expensive part once tiles are large) is skipped.
        @pl.when(blk < num_blocks)
        def _real():
            compute_and_accumulate()
    else:
        compute_and_accumulate()


def _looks_like_dual_tensorcore_chip():
    """Heuristic: does this chip expose two TensorCores per device (v7x)?"""
    try:
        kind = jax.devices()[0].device_kind.lower()
    except Exception:
        return False
    return ("v7" in kind) or ("7x" in kind)


def qfocal_loss(pred, true, *, gamma=1.5, alpha=0.25, pos_weight=1.0,
                tile_rows=4096, approx_sigmoid=True):
    """Scalar mean QFocal loss. pred/true: same shape, any rank, float."""
    assert pred.shape == true.shape
    n_valid = int(pred.size)
    lanes = _LANES

    # Flatten in native dtype (row-major reshape: no HBM copy).
    pred_f = jnp.ravel(pred)
    true_f = jnp.ravel(true)

    # Only if numel is not a multiple of 128 do we pad (<= 127 elements); the
    # pad values are masked out in-kernel, so they never affect the result.
    # TODO(synk): a fully copy-free path for numel % 128 != 0 would keep the
    # data 1-D and mask inside the kernel; not needed for detection-head shapes.
    rem = n_valid % lanes
    if rem:
        pad = lanes - rem
        pred_f = jnp.pad(pred_f, (0, pad))
        true_f = jnp.pad(true_f, (0, pad))

    rows = pred_f.size // lanes
    pred2 = pred_f.reshape(rows, lanes)
    true2 = true_f.reshape(rows, lanes)

    # Sublane multiple required by the narrowest input dtype
    # (8 for 4-byte, 16 for 2-byte, 32 for 1-byte elements).
    sub_mult = max(8,
                   32 // max(int(pred2.dtype.itemsize), 1),
                   32 // max(int(true2.dtype.itemsize), 1))
    # Cap so double-buffered inputs stay <=16 MiB (safe on v7x's 64 MiB VMEM).
    tile_rows = max(sub_mult, min(int(tile_rows), _MAX_TILE_ROWS))
    tile_rows = _round_up(min(tile_rows, _round_up(rows, sub_mult)), sub_mult)

    num_blocks = _cdiv(rows, tile_rows)
    n_outer = 2 if num_blocks >= 2 else 1        # feed both TCs on v7x
    n_inner = _cdiv(num_blocks, n_outer)
    covered = n_outer * n_inner * tile_rows * lanes
    needs_mask = covered != n_valid              # exact tiling -> no mask ops
    has_dup = (n_outer * n_inner) > num_blocks   # clamped duplicate block?

    def in_map(o, i):
        # Clamp so a duplicated trailing block never reads out of bounds;
        # its compute is skipped in-kernel (pl.when), so it adds nothing.
        return (jnp.minimum(o * n_inner + i, num_blocks - 1), 0)

    def out_map(o, i):
        return (o, 0, 0)

    kernel = functools.partial(
        _qfocal_kernel,
        gamma=float(gamma), alpha=float(alpha), pos_weight=float(pos_weight),
        n_valid=n_valid, tile_rows=int(tile_rows), n_inner=int(n_inner),
        num_blocks=int(num_blocks), needs_mask=bool(needs_mask),
        has_dup=bool(has_dup), approx_sigmoid=bool(approx_sigmoid))

    # Explicit VMEM budget: covers double-buffered inputs at the largest tile
    # on every generation (v5e default scoped limit is only 16 MiB).
    block_in_bytes = tile_rows * lanes * (pred2.dtype.itemsize
                                          + true2.dtype.itemsize)
    vmem_limit = int(min(64 * 1024 * 1024,
                         max(32 * 1024 * 1024, 2 * block_in_bytes + (4 << 20))))

    bytes_in = (pred2.size * pred2.dtype.itemsize
                + true2.size * true2.dtype.itemsize)
    cost = pl.CostEstimate(flops=20 * n_valid,
                           transcendentals=4 * n_valid,
                           bytes_accessed=int(bytes_in + n_outer * 8 * lanes * 4))

    grid_spec = pltpu.PrefetchScalarGridSpec(
        num_scalar_prefetch=0,
        grid=(n_outer, n_inner),
        in_specs=[
            pl.BlockSpec((tile_rows, lanes), in_map),
            pl.BlockSpec((tile_rows, lanes), in_map),
        ],
        out_specs=pl.BlockSpec((1, 8, lanes), out_map),
    )

    def make_call(outer_sem):
        return pl.pallas_call(
            kernel,
            out_shape=jax.ShapeDtypeStruct((n_outer, 8, lanes), jnp.float32),
            grid_spec=grid_spec,
            compiler_params=pltpu.CompilerParams(
                dimension_semantics=(outer_sem, pltpu.ARBITRARY),
                vmem_limit_bytes=vmem_limit),
            cost_estimate=cost,
        )

    # On v7x the kernel flips from HBM-bound to EUP/VPU-bound, so genuinely
    # splitting the outer axis across the two TensorCores is worth up to ~2x.
    outer_sem = pltpu.PARALLEL
    if n_outer > 1 and _looks_like_dual_tensorcore_chip():
        outer_sem = pltpu.CORE_PARALLEL

    try:
        partials = make_call(outer_sem)(pred2, true2)
    except Exception:
        if outer_sem is pltpu.PARALLEL:
            raise
        # Fall back to plain parallel if CORE_PARALLEL is rejected.
        partials = make_call(pltpu.PARALLEL)(pred2, true2)

    # Single cross-lane/sublane reduce + mean, done once in XLA.
    return jnp.sum(partials) / jnp.float32(n_valid)


def _qfocal_ref(pred, true, gamma=1.5, alpha=0.25, pos_weight=1.0):
    """Pure-JAX reference (mirrors PyTorch QFocalLoss with BCEWithLogitsLoss)."""
    x = pred.astype(jnp.float32)
    t = true.astype(jnp.float32)
    lw = 1.0 + (pos_weight - 1.0) * t
    bce = (1.0 - t) * x + lw * (jnp.log1p(jnp.exp(-jnp.abs(x)))
                                + jnp.maximum(-x, 0.0))
    p = jax.nn.sigmoid(x)
    alpha_factor = t * alpha + (1.0 - t) * (1.0 - alpha)
    modulating = jnp.abs(t - p) ** gamma
    return jnp.mean(bce * alpha_factor * modulating)


if __name__ == "__main__":
    key = jax.random.PRNGKey(0)
    k1, k2, k3, k4 = jax.random.split(key, 4)

    # Primary: small shape consistent with an object-detection head (NCHW).
    shape = (2, 4, 16, 16)
    pred = jax.random.normal(k1, shape, dtype=jnp.float32) * 2.0      # logits
    true = (jax.random.uniform(k2, shape) > 0.7).astype(jnp.float32)  # targets

    out = jax.block_until_ready(qfocal_loss(pred, true,
                                            gamma=1.5, alpha=0.25))
    ref = _qfocal_ref(pred, true)
    # Tolerance accounts for the EUP approximate reciprocal in the sigmoid.
    assert jnp.allclose(out, ref, rtol=2e-3, atol=1e-5), (out, ref)

    # Secondary: multi-block grid exercising both outer programs, the
    # duplicated clamped block skip and the gated tail mask / stale-row path.
    shape2 = (3, 5, 40, 64)   # 38400 elements -> 300 rows, 5 blocks of 64 rows
    pred_b = jax.random.normal(k3, shape2, dtype=jnp.float32) * 3.0
    true_b = (jax.random.uniform(k4, shape2) > 0.5).astype(jnp.float32)
    out_b = jax.block_until_ready(qfocal_loss(pred_b, true_b, tile_rows=64))
    ref_b = _qfocal_ref(pred_b, true_b)
    assert jnp.allclose(out_b, ref_b, rtol=2e-3, atol=1e-5), (out_b, ref_b)

    print("KERNEL_OK")
</pallas_src>

<mosaic_0001>
module attributes {stable_mosaic.version = 11 : i64} {
  func.func @_qfocal_kernel(%arg0: i32, %arg1: i32, %arg2: memref<16x128xf32, #tpu.memory_space<vmem>>, %arg3: memref<16x128xf32, #tpu.memory_space<vmem>>, %arg4: memref<1x8x128xf32, #tpu.memory_space<vmem>>) attributes {dimension_semantics = [#tpu.dimension_semantics<parallel>, #tpu.dimension_semantics<arbitrary>], iteration_bounds = array<i64: 1, 1>, scalar_prefetch = 0 : i64, scratch_operands = 0 : i64, tpu.core_type = #tpu.core_type<tc>, window_params = [{transform_indices = @transform_0, window_bounds = array<i64: 16, 128>}, {transform_indices = @transform_1, window_bounds = array<i64: 16, 128>}, {transform_indices = @transform_2, window_bounds = array<i64: 1, 8, 128>}]} {
    %c0_i32 = arith.constant 0 : i32
    %0 = arith.cmpi eq, %arg1, %c0_i32 : i32
    %1 = arith.extui %0 : i1 to i32
    %c0_i32_0 = arith.constant 0 : i32
    %2 = arith.cmpi ne, %1, %c0_i32_0 : i32
    scf.if %2 {
      %cst_18 = arith.constant 0.000000e+00 : f32
      %42 = vector.broadcast %cst_18 : f32 to vector<1x8x128xf32>
      %c0_19 = arith.constant 0 : index
      %c0_20 = arith.constant 0 : index
      %c0_21 = arith.constant 0 : index
      %43 = vector.load %arg4[%c0_19, %c0_20, %c0_21] : memref<1x8x128xf32, #tpu.memory_space<vmem>>, vector<1x8x128xf32>
      tpu.vector_store %arg4[%c0_19, %c0_20, %c0_21], %42 {strides = array<i32>} : memref<1x8x128xf32, #tpu.memory_space<vmem>>, vector<1x8x128xf32>,
    } else {
    }
    %c0 = arith.constant 0 : index
    %c0_1 = arith.constant 0 : index
    %3 = vector.load %arg2[%c0, %c0_1] : memref<16x128xf32, #tpu.memory_space<vmem>>, vector<16x128xf32>
    %c0_2 = arith.constant 0 : index
    %c0_3 = arith.constant 0 : index
    %4 = vector.load %arg3[%c0_2, %c0_3] : memref<16x128xf32, #tpu.memory_space<vmem>>, vector<16x128xf32>
    %5 = math.absf %3 : vector<16x128xf32>
    %cst = arith.constant 0.000000e+00 : f32
    %6 = vector.broadcast %cst : f32 to vector<16x128xf32>
    %7 = arith.subf %6, %5 : vector<16x128xf32>
    %8 = math.exp %7 : vector<16x128xf32>
    %9 = math.log1p %8 : vector<16x128xf32>
    %cst_4 = arith.constant 0.000000e+00 : f32
    %10 = vector.broadcast %cst_4 : f32 to vector<16x128xf32>
    %11 = arith.subf %10, %3 : vector<16x128xf32>
    %cst_5 = arith.constant 0.000000e+00 : f32
    %12 = vector.broadcast %cst_5 : f32 to vector<16x128xf32>
    %13 = arith.maximumf %11, %12 : vector<16x128xf32>
    %14 = arith.addf %9, %13 : vector<16x128xf32>
    %cst_6 = arith.constant 1.000000e+00 : f32
    %15 = vector.broadcast %cst_6 : f32 to vector<16x128xf32>
    %16 = arith.subf %15, %4 : vector<16x128xf32>
    %17 = arith.mulf %16, %3 : vector<16x128xf32>
    %18 = arith.addf %17, %14 : vector<16x128xf32>
    %cst_7 = arith.constant 1.000000e+00 : f32
    %19 = vector.broadcast %cst_7 : f32 to vector<16x128xf32>
    %20 = arith.addf %19, %8 : vector<16x128xf32>
    %21 = tpu.reciprocal %20 {approx = true} : vector<16x128xf32> -> vector<16x128xf32>
    %cst_8 = arith.constant 0.000000e+00 : f32
    %22 = vector.broadcast %cst_8 : f32 to vector<16x128xf32>
    %23 = arith.cmpf oge, %3, %22 : vector<16x128xf32>
    %24 = arith.mulf %8, %21 : vector<16x128xf32>
    %25 = arith.select %23, %21, %24 : vector<16x128xi1>, vector<16x128xf32>
    %cst_9 = arith.constant -5.000000e-01 : f32
    %26 = vector.broadcast %cst_9 : f32 to vector<16x128xf32>
    %27 = arith.mulf %4, %26 : vector<16x128xf32>
    %cst_10 = arith.constant 7.500000e-01 : f32
    %28 = vector.broadcast %cst_10 : f32 to vector<16x128xf32>
    %29 = arith.addf %28, %27 : vector<16x128xf32>
    %30 = arith.subf %4, %25 : vector<16x128xf32>
    %31 = math.absf %30 : vector<16x128xf32>
    %32 = math.sqrt %31 : vector<16x128xf32>
    %33 = arith.mulf %31, %32 : vector<16x128xf32>
    %34 = arith.mulf %18, %29 : vector<16x128xf32>
    %35 = arith.mulf %34, %33 : vector<16x128xf32>
    %36 = vector.shape_cast %35 : vector<16x128xf32> to vector<2x8x128xf32>
    %cst_11 = arith.constant dense<0.000000e+00> : vector<8x128xf32>
    %37 = vector.multi_reduction <add>, %36, %cst_11 [0] : vector<2x8x128xf32> to vector<8x128xf32>
    %c0_12 = arith.constant 0 : index
    %c0_13 = arith.constant 0 : index
    %c0_14 = arith.constant 0 : index
    %38 = vector.load %arg4[%c0_12, %c0_13, %c0_14] : memref<1x8x128xf32, #tpu.memory_space<vmem>>, vector<1x8x128xf32>
    %39 = vector.shape_cast %37 : vector<8x128xf32> to vector<1x8x128xf32>
    %40 = arith.addf %38, %39 : vector<1x8x128xf32>
    %c0_15 = arith.constant 0 : index
    %c0_16 = arith.constant 0 : index
    %c0_17 = arith.constant 0 : index
    %41 = vector.load %arg4[%c0_15, %c0_16, %c0_17] : memref<1x8x128xf32, #tpu.memory_space<vmem>>, vector<1x8x128xf32>
    tpu.vector_store %arg4[%c0_15, %c0_16, %c0_17], %40 {strides = array<i32>} : memref<1x8x128xf32, #tpu.memory_space<vmem>>, vector<1x8x128xf32>,
    return
  }
  func.func @transform_0(%arg0: i32, %arg1: i32) -> (i32, i32) {
    %c1_i32 = arith.constant 1 : i32
    %0 = arith.muli %arg0, %c1_i32 : i32
    %1 = arith.addi %0, %arg1 : i32
    %c0_i32 = arith.constant 0 : i32
    %2 = arith.minsi %1, %c0_i32 : i32
    %c0_i32_0 = arith.constant 0 : i32
    %c0_i32_1 = arith.constant 0 : i32
    return %2, %c0_i32_0 : i32, i32
  }
  func.func @transform_1(%arg0: i32, %arg1: i32) -> (i32, i32) {
    %c1_i32 = arith.constant 1 : i32
    %0 = arith.muli %arg0, %c1_i32 : i32
    %1 = arith.addi %0, %arg1 : i32
    %c0_i32 = arith.constant 0 : i32
    %2 = arith.minsi %1, %c0_i32 : i32
    %c0_i32_0 = arith.constant 0 : i32
    %c0_i32_1 = arith.constant 0 : i32
    return %2, %c0_i32_0 : i32, i32
  }
  func.func @transform_2(%arg0: i32, %arg1: i32) -> (i32, i32, i32) {
    %c0_i32 = arith.constant 0 : i32
    %c0_i32_0 = arith.constant 0 : i32
    %c0_i32_1 = arith.constant 0 : i32
    return %arg0, %c0_i32, %c0_i32_0 : i32, i32, i32
  }
}

</mosaic_0001>

<bundles_post_ra>
// kernel: tpu_custom_call.1
= control target key start
LH: loop header
LB: loop body
LE: loop exit
PB: predicated region body
PF: predicated region fallthrough
CT: control target
= control target key end

     0   :  { %7 = vsyncpa [#allocation3], 0  ;;  %s286_s0 = inlined_call_operand.hbm [shape: f32[16,128], index: 0, kind: input, shape index: {}]   ;;  %s287_s1 = inlined_call_operand.hbm [shape: f32[16,128], index: 1, kind: input, shape index: {}]   ;;  %s288_s2 = inlined_call_operand.hbm [shape: f32[1,8,128], index: 2, kind: output, shape index: {}]  }
   0x1   :  { %8 = vsyncpa [#allocation6], 0 }
   0x2   :  { %9 = vsyncpa [#allocation4], 0  ;;  %s257_s9 = smov [#allocation2]  }
   0x3   :  { %s21_s10 = sshll.u32 %s257_s9, 4  ;;  %s22_s10 = int_to_ptr.vmem [resolvable:$true] %s21_s10 }
   0x4   :  { %s199_s11 = scalar_lea.vmem %s22_s10, 256  ;;  %p204_p1 = scmp.lt.s32.totalorder %s22_s10, %s22_s10 }
   0x5   :  { %p200_p0 = scmp.ne.s32.totalorder %s22_s10, %s199_s11  ;;  %p205_p2 = scmp.lt.s32.totalorder %s199_s11, %s199_s11 }
   0x7   :  { %p206_p3 = por %p205_p2, %p204_p1 }
   0x9   :  { %p207_p4 = pnand %p206_p3, %p200_p0 }
   0xb   :  { %210 = shalt.err (!%p207_p4)
}
   0xc   :  { %s258_s12 = smov 128   ;;  %s259_s13 = smov 8  }
   0xd   :  { %27 = dma.hbm_to_vmem [thread:$0]  %s286_s0, 256, %s22_s10, [#allocation3], %s258_s12, %s258_s12, %s259_s13  }
   0xe   :  { %s260_s16 = smov [#allocation5]  }
   0xf   :  { %s39_s17 = sshll.u32 %s260_s16, 4  ;;  %s40_s17 = int_to_ptr.vmem [resolvable:$true] %s39_s17 }
  0x10   :  { %s219_s18 = scalar_lea.vmem %s40_s17, 256  ;;  %p224_p6 = scmp.lt.s32.totalorder %s40_s17, %s40_s17 }
  0x11   :  { %p220_p5 = scmp.ne.s32.totalorder %s40_s17, %s219_s18  ;;  %p225_p7 = scmp.lt.s32.totalorder %s219_s18, %s219_s18 }
  0x13   :  { %p226_p8 = por %p225_p7, %p224_p6 }
  0x15   :  { %p227_p9 = pnand %p226_p8, %p220_p5 }
  0x17   :  { %230 = shalt.err (!%p227_p9)
}
  0x18   :  { %45 = dma.hbm_to_vmem [thread:$0]  %s287_s1, 256, %s40_s17, [#allocation6], %s258_s12, %s258_s12, %s259_s13  }
  0x19   :  { %251 = dma.done.wait [#allocation3], 256  }
  0x1a   :  { %252 = vsyncadd [#allocation3], 4294967040 }
  0x1b   :  { %253 = dma.done.wait [#allocation6], 256  }
  0x1c   :  { %254 = vsyncadd [#allocation6], 4294967040  ;;  %v65_v0 = vld [vmem:[#allocation2] sm:$0xff]  ;;  %v66_v1 = vld [vmem:[#allocation2 + $0x8] sm:$0xff]  ;;  %s261_s0 = smov [#allocation7]  }
  0x1d   :  { %v69_v2 = vand.u32 2147483647, %v65_v0  ;;  %v70_v3 = vand.u32 2147483647, %v66_v1  ;;  %vm111_vm0 = vcmp.ge.f32.partialorder %v65_v0, 0.0  ;;  %v67_v14 = vld [vmem:[#allocation5] sm:$0xff] }
  0x1e   :  { %vm112_vm1 = vcmp.ge.f32.partialorder %v66_v1, 0.0  ;;  %v68_v17 = vld [vmem:[#allocation5 + $0x8] sm:$0xff]  ;;  %v95_v32 = vsub.f32 0.0, %v65_v0  ;;  %v96_v35 = vsub.f32 0.0, %v66_v1  ;;  %v101_v39 = vsub.f32 1.0, %v67_v14  ;;  %s155_s1 = sshll.u32 %s261_s0, 4  ;;  %s156_s1 = int_to_ptr.vmem [resolvable:$true] %s155_s1 }
  0x1f   :  { %v71_v4 = vsub.f32 0.0, %v69_v2  ;;  %v72_v5 = vsub.f32 0.0, %v70_v3  ;;  %v102_v42 = vsub.f32 1.0, %v68_v17  ;;  %v117_v46 = vmul.f32 -0.5, %v67_v14  ;;  %s231_s21 = scalar_lea.vmem %s156_s1, 128  ;;  %p236_p11 = scmp.lt.s32.totalorder %s156_s1, %s156_s1 }
  0x20   :  { %v97_v38 = vmax.f32 %v95_v32, 0.0  ;;  %v98_v41 = vmax.f32 %v96_v35, 0.0  ;;  %v103_v45 = vmul.f32 %v101_v39, %v65_v0  ;;  %v118_v49 = vmul.f32 -0.5, %v68_v17  ;;  %p232_p10 = scmp.ne.s32.totalorder %s156_s1, %s231_s21  ;;  %p237_p12 = scmp.lt.s32.totalorder %s231_s21, %s231_s21 }
  0x21   :  { %v73_v6 = vmul.f32 1.442695, %v71_v4  ;;  %v75_v7 = vmul.f32 1.442695, %v72_v5  ;;  %v104_v48 = vmul.f32 %v102_v42, %v66_v1  ;;  %v119_v51 = vadd.f32 0.75, %v117_v46 }
  0x22   :  { %v120_v54 = vadd.f32 0.75, %v118_v49  ;;  %p238_p13 = por %p237_p12, %p236_p11 }
  0x23   :  { %175 = vpow2.f32 %v73_v6 }
  0x24   :  { %177 = vpow2.f32 %v75_v7  ;;  %p239_p0 = pnand %p238_p13, %p232_p10 }
  0x30   :  { %v176_v8 = vpop.eup %175 }
  0x31   :  { %v178_v9 = vpop.eup %177  ;;  %v77_v10 = vadd.f32 1.0, %v176_v8  ;;  %v80_v15 = vmul.f32 -0.5, %v176_v8  ;;  %v83_v26 = vand.u32 2147483647, %v176_v8 }
  0x32   :  { %v86_v11 = vadd.f32 1.0, %v178_v9  ;;  %v89_v18 = vmul.f32 -0.5, %v178_v9  ;;  %v92_v30 = vand.u32 2147483647, %v178_v9 }
  0x33   :  { %179 = vrcp.f32 %v77_v10  ;;  %v81_v23 = vadd.f32 1.0, %v80_v15  ;;  %vm84_vm2 = vcmp.lt.f32.partialorder %v83_v26, 0.0004427343 }
  0x34   :  { %181 = vrcp.f32 %v86_v11  ;;  %v90_v27 = vadd.f32 1.0, %v89_v18  ;;  %vm93_vm3 = vcmp.lt.f32.partialorder %v92_v30, 0.0004427343 }
  0x35   :  { %183 = vlog2.f32 %v77_v10  ;;  %v82_v34 = vmul.f32 %v176_v8, %v81_v23 }
  0x36   :  { %185 = vlog2.f32 %v86_v11  ;;  %v91_v37 = vmul.f32 %v178_v9, %v90_v27 }
  0x40   :  { %v180_v12 = vpop.eup %179 }
  0x41   :  { %v182_v13 = vpop.eup %181  ;;  %v113_v16 = vmul.f32 %v180_v12, %v176_v8 }
  0x42   :  { %v114_v19 = vmul.f32 %v182_v13, %v178_v9  ;;  %v184_v25 = vpop.eup %183 }
  0x43   :  { %v115_v20 = vsel %vm111_vm0, %v180_v12, %v113_v16  ;;  %v186_v29 = vpop.eup %185  ;;  %v79_v33 = vmul.f32 0.6931472, %v184_v25 }
  0x44   :  { %v116_v21 = vsel %vm112_vm1, %v182_v13, %v114_v19  ;;  %v121_v22 = vsub.f32 %v67_v14, %v115_v20  ;;  %v88_v36 = vmul.f32 0.6931472, %v186_v29 }
  0x45   :  { %v122_v24 = vsub.f32 %v68_v17, %v116_v21  ;;  %v85_v40 = vsel %vm84_vm2, %v82_v34, %v79_v33 }
  0x46   :  { %v123_v28 = vand.u32 2147483647, %v121_v22  ;;  %v94_v43 = vsel %vm93_vm3, %v91_v37, %v88_v36  ;;  %v99_v44 = vadd.f32 %v97_v38, %v85_v40 }
  0x47   :  { %v124_v31 = vand.u32 2147483647, %v122_v24  ;;  %v100_v47 = vadd.f32 %v98_v41, %v94_v43 }
  0x48   :  { %187 = vrsqrt.f32 %v123_v28  ;;  %v105_v50 = vadd.f32 %v103_v45, %v99_v44  ;;  %vm127_vm4 = vcmp.eq.f32.partialorder %v123_v28, inf  ;;  %v130_v55 = vand.u32 2147483648, %v123_v28 }
  0x49   :  { %189 = vrsqrt.f32 %v124_v31  ;;  %v106_v53 = vadd.f32 %v104_v48, %v100_v47  ;;  %vm129_vm5 = vcmp.eq.f32.partialorder %v123_v28, 0.0  ;;  %vm134_vm6 = vcmp.eq.f32.partialorder %v124_v31, inf }
  0x4a   :  { %v137_v58 = vand.u32 2147483648, %v124_v31  ;;  %vm136_vm7 = vcmp.eq.f32.partialorder %v124_v31, 0.0  ;;  %v141_v61 = vmul.f32 %v119_v51, %v105_v50 }
  0x4b   :  { %v142_v0 = vmul.f32 %v120_v54, %v106_v53 }
  0x55   :  { %v188_v52 = vpop.eup %187 }
  0x56   :  { %v190_v56 = vpop.eup %189  ;;  %v126_v57 = vmul.f32 %v188_v52, %v123_v28 }
  0x57   :  { %v133_v59 = vmul.f32 %v190_v56, %v124_v31 }
  0x58   :  { %v128_v60 = vsel %vm127_vm4, %v123_v28, %v126_v57 }
  0x59   :  { %v131_v62 = vsel %vm129_vm5, %v130_v55, %v128_v60  ;;  %v135_v63 = vsel %vm134_vm6, %v124_v31, %v133_v59 }
  0x5a   :  { %v138_v1 = vsel %vm136_vm7, %v137_v58, %v135_v63  ;;  %v139_v2 = vmul.f32 %v131_v62, %v123_v28 }
  0x5b   :  { %v140_v3 = vmul.f32 %v138_v1, %v124_v31 }
  0x5c   :  { %v143_v4 = vmul.f32 %v141_v61, %v139_v2 }
  0x5d   :  { %v144_v5 = vmul.f32 %v142_v0, %v140_v3 }
  0x5f   :  { %v145_v6 = vadd.f32 %v144_v5, %v143_v4 }
  0x61   :  { %148 = vst [vmem:[#allocation7] sm:$0xff] %v145_v6 }
  0x62   :  { %242 = shalt.err (!%p239_p0)
}
  0x63   :  { %158 = dma.vmem_to_hbm [thread:$0]  %s156_s1, 128, %s288_s2, [#allocation4]  }
  0x64   :  { %255 = dma.done.wait [#allocation4], 128  }
  0x65   :  { %256 = vsyncadd [#allocation4], 4294967168 }
  0x66   :  { %162 = vsyncpa [#allocation3], 1 }
  0x67   :  { %163 = vsyncpa [#allocation6], 1 }
  0x68   :  { %164 = vsyncpa [#allocation4], 1 }

</bundles_post_ra>
